<compile_context>
chip_gen: v7x
topology: tpu7x:2x2x1
jax: 0.10.0
libtpu: 0.0.40
codegen_flags: <defaults>
</compile_context>

<pallas_src>
import functools

import jax
import jax.numpy as jnp
from jax.experimental import pallas as pl
from jax.experimental.pallas import tpu as pltpu

HIDDEN_SIZES = (64, 64)
HPAD = 128          # lane-padded hidden width (64 -> 128 for both hidden layers)
APAD = 128          # lane-padded action width (action_dim -> 128)
NEG_INF = -1e30


def _round_up(x, m):
    return ((x + m - 1) // m) * m


def actor_net_kernel(x_ref, w_ref, b_ref, out_ref, *, sd_pad, action_dim):
    """One batch tile of the ActorNet forward pass.

    x_ref   : (TILE_B, sd_pad)        f32  states (feature dim zero-padded)
    w_ref   : (sd_pad + 2*HPAD, 128)  bf16 packed [W1; W2; W3] (zero-padded)
    b_ref   : (8, 128)                f32  rows 0..2 = b1, b2, b3 (zero-padded)
    out_ref : (TILE_B, APAD)          f32  softmax probs; lanes >= action_dim are 0
    """
    w1 = w_ref[0:sd_pad, :]
    w2 = w_ref[sd_pad:sd_pad + HPAD, :]
    w3 = w_ref[sd_pad + HPAD:sd_pad + 2 * HPAD, :]

    # Layer 1: bf16 MXU matmul, f32 accumulation; elementwise math in f32.
    h = jnp.dot(x_ref[...].astype(jnp.bfloat16), w1,
                preferred_element_type=jnp.float32)
    h = jnp.tanh(h + b_ref[0:1, :])

    # Layer 2
    h = jnp.dot(h.astype(jnp.bfloat16), w2, preferred_element_type=jnp.float32)
    h = jnp.tanh(h + b_ref[1:2, :])

    # Final linear
    logits = jnp.dot(h.astype(jnp.bfloat16), w3,
                     preferred_element_type=jnp.float32) + b_ref[2:3, :]

    # Mask padded action lanes so they contribute nothing to the softmax.
    lane = jax.lax.broadcasted_iota(jnp.int32, logits.shape, 1)
    logits = jnp.where(lane < action_dim, logits, NEG_INF)

    # Numerically stable softmax; approx reciprocal uses the otherwise-idle EUP.
    m = jnp.max(logits, axis=-1, keepdims=True)
    e = jnp.exp(logits - m)
    denom = jnp.sum(e, axis=-1, keepdims=True)
    out_ref[...] = (e * pl.reciprocal(denom, approx=True)).astype(out_ref.dtype)


def pack_params(params, state_dim, action_dim):
    """Zero-pad weights/biases to lane-dense widths and pack them."""
    w1, b1, w2, b2, w3, b3 = params
    h1, h2 = HIDDEN_SIZES
    # bf16 packs 16 rows per sublane tile; keep the W2/W3 row offsets aligned.
    sd_pad = _round_up(state_dim, 16)

    def pad2(a, rows, cols):
        return jnp.pad(a, ((0, rows - a.shape[0]), (0, cols - a.shape[1])))

    w1p = pad2(w1, sd_pad, HPAD)
    w2p = pad2(w2, HPAD, HPAD)
    w3p = pad2(w3, HPAD, APAD)
    w_packed = jnp.concatenate([w1p, w2p, w3p], axis=0).astype(jnp.bfloat16)

    b_packed = jnp.zeros((8, HPAD), jnp.float32)
    b_packed = b_packed.at[0, :h1].set(b1.reshape(-1))
    b_packed = b_packed.at[1, :h2].set(b2.reshape(-1))
    b_packed = b_packed.at[2, :action_dim].set(b3.reshape(-1))
    return w_packed, b_packed, sd_pad


def actor_net_forward(state, params, *, tile_b=256):
    """state: (B, state_dim) f32 -> (B, action_dim) softmax probabilities."""
    B, state_dim = state.shape
    action_dim = params[4].shape[1]
    w_packed, b_packed, sd_pad = pack_params(params, state_dim, action_dim)

    tile = _round_up(min(tile_b, _round_up(B, 8)), 8)
    b_pad = _round_up(B, tile)
    x = jnp.pad(state.astype(jnp.float32),
                ((0, b_pad - B), (0, sd_pad - state_dim)))
    nb = b_pad // tile

    kernel = functools.partial(actor_net_kernel, sd_pad=sd_pad,
                               action_dim=action_dim)

    flops = 2 * b_pad * (sd_pad * HPAD + HPAD * HPAD + HPAD * APAD)
    transcendentals = b_pad * (2 * HPAD + APAD)          # 2x tanh + exp
    bytes_accessed = (x.size * 4 + w_packed.size * 2 + b_packed.size * 4
                      + b_pad * APAD * 4)

    out = pl.pallas_call(
        kernel,
        out_shape=jax.ShapeDtypeStruct((b_pad, APAD), jnp.float32),
        grid_spec=pltpu.PrefetchScalarGridSpec(
            num_scalar_prefetch=0,
            grid=(nb,),
            in_specs=[
                pl.BlockSpec((tile, sd_pad), lambda i: (i, 0)),
                # constant block index -> weights/biases stay VMEM-resident
                pl.BlockSpec(w_packed.shape, lambda i: (0, 0)),
                pl.BlockSpec(b_packed.shape, lambda i: (0, 0)),
            ],
            out_specs=pl.BlockSpec((tile, APAD), lambda i: (i, 0)),
        ),
        compiler_params=pltpu.CompilerParams(
            dimension_semantics=("parallel",)),
        cost_estimate=pl.CostEstimate(
            flops=flops, transcendentals=transcendentals,
            bytes_accessed=bytes_accessed),
    )(x, w_packed, b_packed)

    return out[:B, :action_dim]


def init_params(key, state_dim, action_dim, hidden_sizes=HIDDEN_SIZES):
    """Deterministic synthetic init (uniform +-1/sqrt(fan_in), like nn.Linear)."""
    params = []
    prev = state_dim
    dims = list(hidden_sizes) + [action_dim]
    for h in dims:
        key, kw, kb = jax.random.split(key, 3)
        bound = 1.0 / jnp.sqrt(prev)
        w = jax.random.uniform(kw, (prev, h), jnp.float32, -bound, bound)
        b = jax.random.uniform(kb, (1, h), jnp.float32, -bound, bound)
        params += [w, b]
        prev = h
    return tuple(params)


if __name__ == "__main__":
    key = jax.random.PRNGKey(0)
    batch, state_dim, action_dim = 32, 32, 8

    k_state, k_params = jax.random.split(key)
    state = jax.random.normal(k_state, (batch, state_dim), jnp.float32)
    params = init_params(k_params, state_dim, action_dim)

    # tile_b=8 -> grid of 4 batch tiles (exercises the pipelined / parallel path)
    out = actor_net_forward(state, params, tile_b=8)
    out = jax.block_until_ready(out)

    # Matched-precision reference (bf16 matmul inputs, f32 accumulate/elementwise)
    w1, b1, w2, b2, w3, b3 = params

    def bdot(a, w):
        return jnp.dot(a.astype(jnp.bfloat16), w.astype(jnp.bfloat16),
                       preferred_element_type=jnp.float32)

    h = jnp.tanh(bdot(state, w1) + b1)
    h = jnp.tanh(bdot(h, w2) + b2)
    ref = jax.nn.softmax(bdot(h, w3) + b3, axis=-1)

    # Full-f32 reference (exact PyTorch semantics) for a loose sanity check.
    hf = jnp.tanh(state @ w1 + b1)
    hf = jnp.tanh(hf @ w2 + b2)
    ref_f32 = jax.nn.softmax(hf @ w3 + b3, axis=-1)

    assert out.shape == (batch, action_dim)
    assert bool(jnp.all(jnp.isfinite(out)))
    assert jnp.allclose(out, ref, atol=3e-3, rtol=3e-3)
    assert jnp.allclose(out, ref_f32, atol=5e-2)
    assert jnp.allclose(jnp.sum(out, axis=-1), 1.0, atol=3e-3)

    print("KERNEL_OK")
</pallas_src>

<mosaic_0001>
module attributes {stable_mosaic.version = 11 : i64} {
  func.func @actor_net_kernel(%arg0: i32, %arg1: memref<8x32xf32, #tpu.memory_space<vmem>>, %arg2: memref<288x128xbf16, #tpu.memory_space<vmem>>, %arg3: memref<8x128xf32, #tpu.memory_space<vmem>>, %arg4: memref<8x128xf32, #tpu.memory_space<vmem>>) attributes {dimension_semantics = [#tpu.dimension_semantics<parallel>], iteration_bounds = array<i64: 4>, scalar_prefetch = 0 : i64, scratch_operands = 0 : i64, tpu.core_type = #tpu.core_type<tc>, window_params = [{transform_indices = @transform_0, window_bounds = array<i64: 8, 32>}, {pipeline_mode = #tpu.pipeline_mode<synchronous>, transform_indices = @transform_1, window_bounds = array<i64: 288, 128>}, {pipeline_mode = #tpu.pipeline_mode<synchronous>, transform_indices = @transform_2, window_bounds = array<i64: 8, 128>}, {transform_indices = @transform_3, window_bounds = array<i64: 8, 128>}]} {
    %c0 = arith.constant 0 : index
    %c0_0 = arith.constant 0 : index
    %0 = vector.load %arg2[%c0, %c0_0] : memref<288x128xbf16, #tpu.memory_space<vmem>>, vector<32x128xbf16>
    %c32 = arith.constant 32 : index
    %c0_1 = arith.constant 0 : index
    %1 = vector.load %arg2[%c32, %c0_1] : memref<288x128xbf16, #tpu.memory_space<vmem>>, vector<128x128xbf16>
    %c160 = arith.constant 160 : index
    %c0_2 = arith.constant 0 : index
    %2 = vector.load %arg2[%c160, %c0_2] : memref<288x128xbf16, #tpu.memory_space<vmem>>, vector<128x128xbf16>
    %c0_3 = arith.constant 0 : index
    %c0_4 = arith.constant 0 : index
    %3 = vector.load %arg1[%c0_3, %c0_4] : memref<8x32xf32, #tpu.memory_space<vmem>>, vector<8x32xf32>
    %4 = arith.truncf %3 : vector<8x32xf32> to vector<8x32xbf16>
    %cst = arith.constant dense<0.000000e+00> : vector<8x128xf32>
    %5 = tpu.matmul %4, %0, %cst {dimension_numbers = #tpu.dot_dimension_numbers<[1], [0], [0], [1], [0, 0, 1, 1], [], []>} : vector<8x32xbf16>, vector<32x128xbf16>, vector<8x128xf32> -> vector<8x128xf32>
    %c0_5 = arith.constant 0 : index
    %c0_6 = arith.constant 0 : index
    %6 = vector.load %arg3[%c0_5, %c0_6] : memref<8x128xf32, #tpu.memory_space<vmem>>, vector<1x128xf32>
    %7 = vector.broadcast %6 : vector<1x128xf32> to vector<8x128xf32>
    %8 = arith.addf %5, %7 : vector<8x128xf32>
    %9 = math.tanh %8 : vector<8x128xf32>
    %10 = arith.truncf %9 : vector<8x128xf32> to vector<8x128xbf16>
    %cst_7 = arith.constant dense<0.000000e+00> : vector<8x128xf32>
    %11 = tpu.matmul %10, %1, %cst_7 {dimension_numbers = #tpu.dot_dimension_numbers<[1], [0], [0], [1], [0, 0, 1, 1], [], []>} : vector<8x128xbf16>, vector<128x128xbf16>, vector<8x128xf32> -> vector<8x128xf32>
    %c1 = arith.constant 1 : index
    %c0_8 = arith.constant 0 : index
    %12 = vector.load %arg3[%c1, %c0_8] : memref<8x128xf32, #tpu.memory_space<vmem>>, vector<1x128xf32>
    %13 = vector.broadcast %12 : vector<1x128xf32> to vector<8x128xf32>
    %14 = arith.addf %11, %13 : vector<8x128xf32>
    %15 = math.tanh %14 : vector<8x128xf32>
    %16 = arith.truncf %15 : vector<8x128xf32> to vector<8x128xbf16>
    %cst_9 = arith.constant dense<0.000000e+00> : vector<8x128xf32>
    %17 = tpu.matmul %16, %2, %cst_9 {dimension_numbers = #tpu.dot_dimension_numbers<[1], [0], [0], [1], [0, 0, 1, 1], [], []>} : vector<8x128xbf16>, vector<128x128xbf16>, vector<8x128xf32> -> vector<8x128xf32>
    %c2 = arith.constant 2 : index
    %c0_10 = arith.constant 0 : index
    %18 = vector.load %arg3[%c2, %c0_10] : memref<8x128xf32, #tpu.memory_space<vmem>>, vector<1x128xf32>
    %19 = vector.broadcast %18 : vector<1x128xf32> to vector<8x128xf32>
    %20 = arith.addf %17, %19 : vector<8x128xf32>
    %21 = tpu.iota {dimensions = array<i32: 1>} : vector<8x128xi32>
    %c8_i32 = arith.constant 8 : i32
    %22 = vector.broadcast %c8_i32 : i32 to vector<8x128xi32>
    %23 = arith.cmpi slt, %21, %22 : vector<8x128xi32>
    %cst_11 = arith.constant -1.000000e+30 : f32
    %24 = vector.broadcast %cst_11 : f32 to vector<8x128xf32>
    %25 = arith.select %23, %20, %24 : vector<8x128xi1>, vector<8x128xf32>
    %cst_12 = arith.constant dense<0xFF800000> : vector<8xf32>
    %26 = vector.multi_reduction <maximumf>, %25, %cst_12 [1] : vector<8x128xf32> to vector<8xf32>
    %27 = vector.shape_cast %26 : vector<8xf32> to vector<8x1xf32>
    %28 = vector.broadcast %27 : vector<8x1xf32> to vector<8x128xf32>
    %29 = arith.subf %25, %28 : vector<8x128xf32>
    %30 = math.exp %29 : vector<8x128xf32>
    %cst_13 = arith.constant dense<0.000000e+00> : vector<8xf32>
    %31 = vector.multi_reduction <add>, %30, %cst_13 [1] : vector<8x128xf32> to vector<8xf32>
    %32 = vector.shape_cast %31 : vector<8xf32> to vector<8x1xf32>
    %33 = tpu.reciprocal %32 {approx = true} : vector<8x1xf32> -> vector<8x1xf32>
    %34 = vector.broadcast %33 : vector<8x1xf32> to vector<8x128xf32>
    %35 = arith.mulf %30, %34 : vector<8x128xf32>
    %c0_14 = arith.constant 0 : index
    %c0_15 = arith.constant 0 : index
    %36 = vector.load %arg4[%c0_14, %c0_15] : memref<8x128xf32, #tpu.memory_space<vmem>>, vector<8x128xf32>
    tpu.vector_store %arg4[%c0_14, %c0_15], %35 {strides = array<i32>} : memref<8x128xf32, #tpu.memory_space<vmem>>, vector<8x128xf32>,
    return
  }
  func.func @transform_0(%arg0: i32) -> (i32, i32) {
    %c0_i32 = arith.constant 0 : i32
    %c0_i32_0 = arith.constant 0 : i32
    return %arg0, %c0_i32 : i32, i32
  }
  func.func @transform_1(%arg0: i32) -> (i32, i32) {
    %c0_i32 = arith.constant 0 : i32
    %c0_i32_0 = arith.constant 0 : i32
    %c0_i32_1 = arith.constant 0 : i32
    return %c0_i32, %c0_i32_0 : i32, i32
  }
  func.func @transform_2(%arg0: i32) -> (i32, i32) {
    %c0_i32 = arith.constant 0 : i32
    %c0_i32_0 = arith.constant 0 : i32
    %c0_i32_1 = arith.constant 0 : i32
    return %c0_i32, %c0_i32_0 : i32, i32
  }
  func.func @transform_3(%arg0: i32) -> (i32, i32) {
    %c0_i32 = arith.constant 0 : i32
    %c0_i32_0 = arith.constant 0 : i32
    return %arg0, %c0_i32 : i32, i32
  }
}

</mosaic_0001>

<bundles_post_ra>
// kernel: tpu_custom_call.1
= control target key start
LH: loop header
LB: loop body
LE: loop exit
PB: predicated region body
PF: predicated region fallthrough
CT: control target
= control target key end

     0   :  { %8 = vsyncpa [#allocation3], 0  ;;  %s1258_s0 = inlined_call_operand.hbm [shape: f32[32,32], index: 0, kind: input, shape index: {}]   ;;  %s1259_s1 = inlined_call_operand.hbm [shape: bf16[288,128], index: 1, kind: input, shape index: {}]   ;;  %s1260_s2 = inlined_call_operand.hbm [shape: f32[8,128], index: 2, kind: input, shape index: {}]   ;;  %s1261_s3 = inlined_call_operand.hbm [shape: f32[32,128], index: 3, kind: output, shape index: {}]  }
   0x1   :  { %10 = vsyncpa [#allocation3 + $0x1], 0 }
   0x2   :  { %11 = vsyncpa [#allocation6], 0 }
   0x3   :  { %12 = vsyncpa [#allocation4], 0 }
   0x4   :  { %14 = vsyncpa [#allocation4 + $0x1], 0  ;;  %s1010_s12 = smov 0   ;;  %s1012_s13 = smov 0  }
   0x5   :  { %s1014_s14 = smov 0   ;;  %s1016_s15 = smov 0  }
   0x6 LB: > { %s1031_s16 = sadd.s32 4294967295, %s980_s15   ;;  %s620_s17 = sadd.s32 4294967294, %s980_s15   ;;  %s980_s15 = sphi %s1016_s15, %s1280_s15   ;;  %s976_s14 = sphi %s1014_s14, %s1279_s14   ;;  %s972_s13 = sphi %s1012_s13, %s1278_s13   ;;  %s968_s12 = sphi %s1010_s12, %s1277_s12  }
   0x7   : > { %p40_p0 = scmp.ne.s32.totalorder %s972_s13, %s968_s12  ;;  %p1262_p1 = scmp.eq.s32.totalorder %s1031_s16, 0 }
   0x8   : > { %p112_p3 = scmp.eq.s32.totalorder %s620_s17, 3  ;;  %p621_p5 = scmp.ge.s32.totalorder %s980_s15, 1 }
   0x9   : > { %p1040_p4 = por %p1262_p1, %p40_p0  ;;  %p119_p7 = scmp.lt.s32.totalorder %s980_s15, 5 }
   0xa   : > { %p1045_p6 = por %p112_p3, %p40_p0  ;;  %s982_s21 = smov [#allocation5]  }
   0xb   : > { %s1265_s18 = scalar_select %p1040_p4, 1, 0 }
   0xc   : > { %s1266_s19 = scalar_select %p1045_p6, 1, 0 }
   0xd   : > { %p1050_p8 = pnand %p621_p5, %p119_p7  ;;  %s131_s22 = sshll.u32 %s982_s21, 4  ;;  %s132_s22 = int_to_ptr.vmem [resolvable:$true] %s131_s22 }
   0xe   : > { %s983_s24 = smov [#allocation7]   ;;  %s824_s28 = scalar_lea.hbm %s1259_s1, 2304 }
   0xf   : > { %s1267_s20 = scalar_select %p1050_p8, 1, 0 }
  0x10   : > { %p739_p9 = pneg %p1050_p8  ;;  %s145_s25 = sshll.u32 %s983_s24, 4  ;;  %s1062_s25 = int_to_ptr.vmem [resolvable:$true] %s145_s25 }
  0x11   : > { %p825_p11 = scmp.ne.s32.totalorder %s1259_s1, %s824_s28  ;;  %p831_p3 = scmp.lt.u32.totalorder %s824_s28, %s1259_s1 }
  0x12   : > { %p1058_p10 = pnand %p739_p9, %p1262_p1 }
  0x14   : > { %p826_p12 = pneg %p1058_p10 }
  0x16   : > { %p827_p13 = pnand %p826_p12, %p825_p11 }
  0x18   : > { %p828_p0 = pneg %p827_p13 }
  0x1a   : > { %p833_p5 = pnand %p831_p3, %p828_p0 }
  0x1c   : > { %836 = shalt.err (!%p833_p5)
}
  0x1d   : > { %s837_s6 = scalar_lea.vmem %s132_s22, 2304  ;;  %p845_p2 = scmp.lt.s32.totalorder %s132_s22, %s132_s22 }
  0x1e   : > { %p838_p7 = scmp.ne.s32.totalorder %s132_s22, %s837_s6  ;;  %p846_p6 = scmp.lt.s32.totalorder %s837_s6, %s837_s6 }
  0x20   : > { %p840_p9 = pnand %p838_p7, %p826_p12  ;;  %p847_p4 = por %p846_p6, %p845_p2 }
  0x22   : > { %p841_p1 = pneg %p840_p9 }
  0x24   : > { %p848_p8 = pnand %p847_p4, %p841_p1 }
  0x26   : > { %851 = shalt.err (!%p848_p8)
}
  0x27   : > { %s984_s7 = smov 64   ;;  %s985_s8 = smov 4  }
  0x28   : > { %742 = dma.hbm_to_vmem [thread:$0]  (!%p1058_p10), %s1259_s1, 2304, %s132_s22, [#allocation6], %s984_s7, %s984_s7, %s985_s8  }
  0x29   : > { %s852_s21 = scalar_lea.hbm %s1260_s2, 128 }
  0x2a   : > { %p853_p11 = scmp.ne.s32.totalorder %s1260_s2, %s852_s21  ;;  %p859_p4 = scmp.lt.u32.totalorder %s852_s21, %s1260_s2 }
  0x2c   : > { %p855_p1 = pnand %p853_p11, %p826_p12 }
  0x2e   : > { %p856_p2 = pneg %p855_p1 }
  0x30   : > { %p861_p6 = pnand %p859_p4, %p856_p2 }
  0x32   : > { %864 = shalt.err (!%p861_p6)
}
  0x33   : > { %s865_s22 = scalar_lea.vmem %s1062_s25, 128  ;;  %p873_p3 = scmp.lt.s32.totalorder %s1062_s25, %s1062_s25 }
  0x34   : > { %p866_p8 = scmp.ne.s32.totalorder %s1062_s25, %s865_s22  ;;  %p874_p5 = scmp.lt.s32.totalorder %s865_s22, %s865_s22 }
  0x36   : > { %p868_p13 = pnand %p866_p8, %p826_p12  ;;  %p875_p7 = por %p874_p5, %p873_p3 }
  0x38   : > { %p869_p0 = pneg %p868_p13 }
  0x3a   : > { %p876_p9 = pnand %p875_p7, %p869_p0 }
  0x3c   : > { %879 = shalt.err (!%p876_p9)
}
  0x3d   : > { %745 = dma.hbm_to_vmem [thread:$0]  (!%p1058_p10), %s1260_s2, 128, %s1062_s25, [#allocation6]  }
  0x3e   : > { %s1112_s4 = sadd.s32 1, %s980_s15   ;;  %s27_s23 = sadd.s32 1, %s976_s14 }
  0x3f   : > { %s24_s5 = ssub.s32 %s980_s15, %s1112_s4  ;;  %p34_p12 = scmp.ne.s32.totalorder %s976_s14, %s972_s13 }
  0x40   : > { %p25_p11 = scmp.eq.s32.totalorder %s24_s5, 0  ;;  %p35_p1 = scmp.eq.s32.totalorder %s980_s15, 0 }
  0x41   : > { %p1269_p2 = scmp.eq.s32.totalorder %s1031_s16, 3  ;;  %p756_p6 = scmp.lt.s32.totalorder %s980_s15, 4 }
  0x42   : > { %s1128_s7 = scalar_select %p25_p11, %s976_s14, %s27_s23  }
  0x43   : > { %p1122_p4 = por %p1269_p2, %p34_p12  ;;  %p36_p8 = por %p35_p1, %p34_p12 }
  0x44   : > { %s156_s8 = sand.u32 1, %s976_s14   ;;  %s626_s25 = sshll.u32 %s980_s15, 7 }
  0x45   : > { %s625_s9 = sshll.u32 %s156_s8, 3  ;;  %s1135_s17 = scalar_lea.hbm %s1258_s0, %s626_s25 }
  0x46   : > { %s160_s21 = scalar_lea.vmem [#allocation2], %s625_s9  ;;  %p1139_p10 = pnand %p756_p6, %p36_p8 }
  0x47   : > { %s167_s24 = sshll.u32 %s160_s21, 4  ;;  %s157_s27 = scalar_lea.sflag [#allocation3], %s156_s8  ;;  %s1137_s24 = int_to_ptr.vmem [resolvable:$true] %s167_s24 }
  0x48   : > { %s880_s28 = scalar_lea.hbm %s1135_s17, 128  ;;  %p882_p0 = pneg %p1139_p10 }
  0x49   : > { %p881_p13 = scmp.ne.s32.totalorder %s1135_s17, %s880_s28  ;;  %s885_s30 = scalar_lea.hbm %s1258_s0, 512 }
  0x4a   : > { %p886_p7 = scmp.lt.u32.totalorder %s1135_s17, %s1258_s0  ;;  %p887_p9 = scmp.lt.u32.totalorder %s885_s30, %s880_s28 }
  0x4b   : > { %p883_p3 = pnand %p882_p0, %p881_p13  ;;  %p889_p11 = scmp.lt.u32.totalorder %s880_s28, %s1135_s17 }
  0x4c   : > { %p888_p12 = por %p887_p9, %p886_p7 }
  0x4d   : > { %p884_p5 = pneg %p883_p3 }
  0x4e   : > { %p890_p1 = por %p889_p11, %p888_p12 }
  0x50   : > { %p891_p2 = pnand %p890_p1, %p884_p5 }
  0x52   : > { %894 = shalt.err (!%p891_p2)
}
  0x53   : > { %s895_s8 = scalar_lea.vmem %s1137_s24, 128  ;;  %s986_s9 = smov [#allocation2]  }
  0x54   : > { %p896_p6 = scmp.ne.s32.totalorder %s1137_s24, %s895_s8  ;;  %s900_s25 = sshll.u32 %s986_s9, 4  ;;  %s901_s25 = int_to_ptr.vmem [resolvable:$false] %s900_s25 }
  0x55   : > { %s902_s10 = scalar_lea.vmem %s901_s25, 256  ;;  %p903_p3 = scmp.lt.s32.totalorder %s1137_s24, %s901_s25 }
  0x56   : > { %p898_p8 = pnand %p896_p6, %p882_p0  ;;  %p904_p7 = scmp.lt.s32.totalorder %s902_s10, %s895_s8 }
  0x58   : > { %p899_p13 = pneg %p898_p8  ;;  %p905_p9 = por %p904_p7, %p903_p3 }
  0x5a   : > { %p906_p12 = pnand %p905_p9, %p899_p13 }
  0x5c   : > { %909 = shalt.err (!%p906_p12)
}
  0x5d   : > { %749 = dma.hbm_to_vmem [thread:$0]  (!%p1139_p10), %s1135_s17, 128, %s1137_s24, %s157_s27  }
  0x5e   : > { %p1272_p5 = scmp.ne.s32.totalorder %s1267_s20, 0 }
  0x5f   : > { %s1171_s11 = sand.u32 (!%p1272_p5), 1, %s972_s13   ;;  %p1273_p0 = scmp.ne.s32.totalorder (!%p1272_p5), %s1265_s18, 0 }
  0x60   : > { %176 = sbr.rel (%p1272_p5) target bundleno = 1112 (0x458), region = 32  ;;  %s628_s21 = sshll.u32 (!%p1272_p5), %s1171_s11, 3 }
  0x61   : > { %s179_s28 = scalar_lea.sflag (!%p1272_p5), [#allocation3], %s1171_s11  ;;  %s182_s22 = scalar_lea.vmem (!%p1272_p5), [#allocation2], %s628_s21 }
  0x67   : > { %955 = dma.done.wait (%p1273_p0), %s179_s28, 128  }
  0x68   : > { %957 = vsyncadd (%p1273_p0), %s179_s28, 4294967168  ;;  %p1274_p10 = scmp.eq.s32.totalorder %s1031_s16, 0 }
  0x6a   : > { %959 = dma.done.wait (%p1274_p10), [#allocation6], 2432   ;;  %p1275_p11 = pmov %p1274_p10 }
  0x6b   : > { %v987_v0 = vmov 0.0   ;;  %vm988_vm0 = vmmov 0   ;;  %v798_v1 = vld [vmem:[#allocation5] sm:$0xff]   ;;  %v799_v2 = vld [vmem:[#allocation5 + $0x8] sm:$0xff]   ;;  %v250_v3 = vld [vmem:[%s182_s22] sm:$0xff]  ;;  %vm269_vm1 = vcmask 261120   ;;  %v503_v37 = vlaneseq }
  0x6c   : > { %961 = vsyncadd (%p1275_p11), [#allocation6], 4294964864  ;;  %679 = vmatprep.subr.bf16.mxu0 %v987_v0  ;;  %683 = vmatprep.mubr.msk.bf16.mxu0 %vm988_vm0, %v987_v0  ;;  %v800_v4 = vld [vmem:[#allocation5 + $0x10] sm:$0xff]   ;;  %v251_v5 = vpack.c.bf16 %v250_v3, %v250_v3  ;;  %v801_v6 = vld [vmem:[#allocation5 + $0x18] sm:$0xff]   ;;  %s655_s18 = sshll.u32 %s1031_s16, 7  ;;  %s212_s20 = scalar_lea.vmem [#allocation8], %s628_s21 }
  0x6d   : > { %687 = vmatprep.subr.bf16.mxu1 %v987_v0  ;;  %703 = vmatprep.mubr.msk.bf16.mxu1 %vm988_vm0, %v987_v0  ;;  %v802_v7 = vld [vmem:[#allocation5 + $0x20] sm:$0xff]   ;;  %v803_v8 = vld [vmem:[#allocation5 + $0x28] sm:$0xff]   ;;  %v804_v9 = vld [vmem:[#allocation5 + $0x30] sm:$0xff]   ;;  %v504_v38 = vand.u32 127, %v503_v37  ;;  %s531_s17 = sshll.u32 %s212_s20, 4  ;;  %s1215_s27 = scalar_lea.hbm %s1261_s3, %s655_s18  ;;  %s1217_s17 = int_to_ptr.vmem [resolvable:$true] %s531_s17 }
  0x6e   : > { %680 = vmatpush3.bf16.msra.mxu0 %v798_v1  ;;  %688 = vmatpush3.bf16.msra.mxu1 %v800_v4  ;;  %v805_v10 = vld [vmem:[#allocation5 + $0x38] sm:$0xff]   ;;  %v806_v11 = vld [vmem:[#allocation5 + $0x40] sm:$0xff]   ;;  %v807_v12 = vld [vmem:[#allocation5 + $0x48] sm:$0xff]   ;;  %s518_s29 = scalar_lea.sflag [#allocation4], %s1171_s11  ;;  %s910_s30 = scalar_lea.vmem %s1217_s17, 128 }
  0x6f   : > { %681 = vmatprep.subr.bf16.mxu0 %v987_v0  ;;  %689 = vmatprep.subr.bf16.mxu1 %v987_v0  ;;  %v808_v13 = vld [vmem:[#allocation5 + $0x50] sm:$0xff]   ;;  %v809_v14 = vld [vmem:[#allocation5 + $0x58] sm:$0xff]   ;;  %v810_v15 = vld [vmem:[#allocation5 + $0x60] sm:$0xff]   ;;  %vm505_vm2 = vcmp.lt.s32.totalorder %v504_v38, 8  ;;  %p911_p1 = scmp.ne.s32.totalorder %s1217_s17, %s910_s30  ;;  %s989_s16 = smov [#allocation8]  }
  0x70   : > { %v811_v16 = vld [vmem:[#allocation5 + $0x68] sm:$0xff]   ;;  %v632_v17 = vld [vmem:[#allocation7] ss:$0 sm:$0xff]  ;;  %v813_v26 = vld [vmem:[#allocation5 + $0x78] sm:$0xff]   ;;  %s914_s23 = sshll.u32 %s989_s16, 4  ;;  %s915_s23 = int_to_ptr.vmem [resolvable:$false] %s914_s23 }
  0x71   : > { %v812_v25 = vld [vmem:[#allocation5 + $0x70] sm:$0xff]   ;;  %v814_v27 = vld [vmem:[#allocation5 + $0x80] sm:$0xff]   ;;  %v815_v28 = vld [vmem:[#allocation5 + $0x88] sm:$0xff]   ;;  %p912_p2 = pnand %p911_p1, %p1122_p4  ;;  %s916_s5 = scalar_lea.vmem %s915_s23, 256 }
  0x72   : > { %682 = vmatpush3.bf16.msra.mxu0 %v799_v2  ;;  %690 = vmatpush3.bf16.msra.mxu1 %v801_v6  ;;  %v636_v29 = vld [vmem:[#allocation7 + $0x1] ss:$0 sm:$0xff]  ;;  %v645_v39 = vld [vmem:[#allocation7 + $0x2] ss:$0 sm:$0xff]  ;;  %p917_p8 = scmp.lt.s32.totalorder %s1217_s17, %s915_s23  ;;  %p918_p13 = scmp.lt.s32.totalorder %s916_s5, %s910_s30 }
  0x73   : > { %707 = vmatprep.subr.bf16.mxu0 %v987_v0  ;;  %691 = vmatprep.subr.bf16.mxu1 %v987_v0  ;;  %p913_p6 = pneg %p912_p2 }
  0x74   : > { %p919_p3 = por %p918_p13, %p917_p8 }
  0x75   : > { %684 = vmatmul.mubr.msk.bf16.vlgmr.msra.gmra.mrb[0].mxu0 %vm269_vm1, %v251_v5 }
  0x76   : > { %723 = vmatprep.mubr.msk.bf16.mxu0 %vm988_vm0, %v987_v0  ;;  %692 = vmatpush3.bf16.msra.mxu1 %v802_v7  ;;  %p920_p7 = pnand %p919_p3, %p913_p6 }
  0x77   : > { %693 = vmatprep.subr.bf16.mxu1 %v987_v0  ;;  %708 = vmatpush3.bf16.msra.mxu0 %v808_v13 }
  0x78   : > { %709 = vmatprep.subr.bf16.mxu0 %v987_v0 }
  0x7a   : > { %694 = vmatpush3.bf16.msra.mxu1 %v803_v8 }
  0x7b   : > { %695 = vmatprep.subr.bf16.mxu1 %v987_v0  ;;  %710 = vmatpush3.bf16.msra.mxu0 %v809_v14 }
  0x7c   : > { %711 = vmatprep.subr.bf16.mxu0 %v987_v0 }
  0x7e   : > { %696 = vmatpush3.bf16.msra.mxu1 %v804_v9 }
  0x7f   : > { %697 = vmatprep.subr.bf16.mxu1 %v987_v0  ;;  %712 = vmatpush3.bf16.msra.mxu0 %v810_v15 }
  0x80   : > { %713 = vmatprep.subr.bf16.mxu0 %v987_v0 }
  0x82   : > { %698 = vmatpush3.bf16.msra.mxu1 %v805_v10 }
  0x83   : > { %699 = vmatprep.subr.bf16.mxu1 %v987_v0  ;;  %714 = vmatpush3.bf16.msra.mxu0 %v811_v16 }
  0x84   : > { %715 = vmatprep.subr.bf16.mxu0 %v987_v0 }
  0x86   : > { %700 = vmatpush3.bf16.msra.mxu1 %v806_v11 }
  0x87   : > { %701 = vmatprep.subr.bf16.mxu1 %v987_v0  ;;  %716 = vmatpush3.bf16.msra.mxu0 %v812_v25 }
  0x88   : > { %717 = vmatprep.subr.bf16.mxu0 %v987_v0 }
  0x8a   : > { %702 = vmatpush3.bf16.msra.mxu1 %v807_v12 }
  0x8b   : > { %718 = vmatpush3.bf16.msra.mxu0 %v813_v26 }
  0x8c   : > { %719 = vmatprep.subr.bf16.mxu0 %v987_v0 }
  0x8f   : > { %720 = vmatpush3.bf16.msra.mxu0 %v814_v27 }
  0x90   : > { %721 = vmatprep.subr.bf16.mxu0 %v987_v0 }
  0x93   : > { %722 = vmatpush3.bf16.msra.mxu0 %v815_v28 }
 0x148   : > { %v307_v18 = vpop.f32.mrb[0].mxu0 }
 0x149   : > { %v308_v19 = vadd.f32 %v632_v17, %v307_v18  ;;  %v685_v20 = vpop.f32.mrb[1].mxu0 }
 0x14a   : > { %v310_v21 = vpop.f32.mrb[2].mxu0 }
 0x14b   : > { %816 = vtanh.f32 %v308_v19  ;;  %v686_v22 = vpop.f32.mrb[3].mxu0 }
 0x155   : > { %v817_v23 = vpop.eup %816 }
 0x156   : > { %v314_v24 = vpack.c.bf16 %v817_v23, %v817_v23 }
 0x158   : > { %704 = vmatmul.mubr.bf16.vlgmr.msra.gmra.mrb[0].mxu1 %v314_v24 }
 0x22b   : > { %v402_v30 = vpop.f32.mrb[0].mxu1 }
 0x22c   : > { %v403_v31 = vadd.f32 %v636_v29, %v402_v30  ;;  %v705_v32 = vpop.f32.mrb[1].mxu1 }
 0x22d   : > { %v405_v33 = vpop.f32.mrb[2].mxu1 }
 0x22e   : > { %818 = vtanh.f32 %v403_v31  ;;  %v706_v34 = vpop.f32.mrb[3].mxu1 }
 0x238   : > { %v819_v35 = vpop.eup %818 }
 0x239   : > { %v409_v36 = vpack.c.bf16 %v819_v35, %v819_v35 }
 0x23b   : > { %724 = vmatmul.mubr.bf16.vlgmr.msra.gmra.mrb[4].mxu0 %v409_v36 }
 0x30e   : > { %v497_v40 = vpop.f32.mrb[4].mxu0 }
 0x30f   : > { %v498_v41 = vadd.f32 %v645_v39, %v497_v40  ;;  %v725_v42 = vpop.f32.mrb[5].mxu0 }
 0x310   : > { %v500_v43 = vpop.f32.mrb[6].mxu0 }
 0x311   : > { %v726_v44 = vpop.f32.mrb[7].mxu0  ;;  %v506_v45 = vsel %vm505_vm2, %v498_v41, -1e+30 }
 0x312   : > { %507 = vmax.xlane.f32.xlu0 %v506_v45 }
 0x39f   : > { %v508_v46 = vpop.xlane.xlu0 %507 }
 0x3a0   : > { %v509_v47 = vsub.f32 %v506_v45, %v508_v46 }
 0x3a2   : > { %v510_v48 = vmul.f32 1.442695, %v509_v47 }
 0x3a4   : > { %820 = vpow2.f32 %v510_v48 }
 0x3ae   : > { %v821_v49 = vpop.eup %820 }
 0x3af   : > { %512 = vadd.xlane.f32.xlu0 %v821_v49 }
 0x43c   : > { %v513_v50 = vpop.xlane.xlu0 %512 }
 0x43d   : > { %822 = vrcp.f32 %v513_v50 }
 0x447   : > { %v823_v51 = vpop.eup %822 }
 0x448   : > { %v515_v52 = vmul.f32 %v823_v51, %v821_v49 }
 0x44a   : > { %516 = vst [vmem:[%s212_s20] sm:$0xff] %v515_v52 }
 0x44b   : > { %923 = shalt.err (!%p920_p7)
}
 0x44c   : > { %s924_s8 = scalar_lea.hbm %s1215_s27, 128  ;;  %s928_s10 = scalar_lea.hbm %s1261_s3, 512 }
 0x44d   : > { %p925_p9 = scmp.ne.s32.totalorder %s1215_s27, %s924_s8  ;;  %p929_p0 = scmp.lt.u32.totalorder %s1215_s27, %s1261_s3 }
 0x44e   : > { %p930_p10 = scmp.lt.u32.totalorder %s928_s10, %s924_s8  ;;  %p932_p1 = scmp.lt.u32.totalorder %s924_s8, %s1215_s27 }
 0x44f   : > { %p926_p12 = pnand %p925_p9, %p1122_p4 }
 0x450   : > { %p931_p11 = por %p930_p10, %p929_p0 }
 0x451   : > { %p927_p5 = pneg %p926_p12 }
 0x452   : > { %p933_p2 = por %p932_p1, %p931_p11 }
 0x454   : > { %p934_p6 = pnand %p933_p2, %p927_p5 }
 0x456   : > { %937 = shalt.err (!%p934_p6)
}
 0x457   : > { %737 = dma.vmem_to_hbm [thread:$0]  (%p1122_p4), %s1217_s17, 128, %s1215_s27, %s518_s29  }
 0x458 PF: > { %p759_p8 = scmp.ge.s32.totalorder %s980_s15, 2  ;;  %s543_s28 = sand.u32 1, %s968_s12  }
 0x459   : > { %p1276_p13 = scmp.ne.s32.totalorder %s1266_s19, 0  ;;  %s544_s22 = scalar_lea.sflag [#allocation4], %s543_s28 }
 0x45b   : > { %p751_p3 = pnand %p759_p8, %p1276_p13 }
 0x45d   : > { %963 = dma.done.wait (!%p751_p3), %s544_s22, 128  }
 0x45e   : > { %965 = vsyncadd (!%p751_p3), %s544_s22, 4294967168  ;;  %p17_p7 = scmp.ge.s32.totalorder %s1112_s4, 6   ;;  %s1277_s12 = smov %s972_s13 }
 0x45f   : > { %s1278_s13 = smov %s976_s14  ;;  %s1279_s14 = smov %s1128_s7 }
 0x460   : > { %s1280_s15 = smov %s1112_s4  ;;  %19 = sbr.rel (!%p17_p7) target bundleno = 6 (0x6), region = 85 }
 0x467   :  { %549 = vsyncpa [#allocation3], 1 }
 0x468   :  { %551 = vsyncpa [#allocation3 + $0x1], 1 }
 0x469   :  { %552 = vsyncpa [#allocation6], 1 }
 0x46a   :  { %553 = vsyncpa [#allocation4], 1 }
 0x46b   :  { %555 = vsyncpa [#allocation4 + $0x1], 1 }

</bundles_post_ra>
